<compile_context>
chip_gen: v5e
topology: v5e:2x2
jax: 0.10.0
libtpu: 0.0.40
codegen_flags: <defaults>
</compile_context>

<pallas_src>
import functools

import jax
import jax.numpy as jnp
from jax.experimental import pallas as pl
from jax.experimental.pallas import tpu as pltpu

LANES = 128
SUBLANES = 8
STRIP_ROWS = 512          # compute-strip height inside one DMA block


def _tpu_caps():
    """Generation-aware (max block rows, vmem limit, tensorcore split)."""
    kind = ""
    try:
        kind = jax.devices()[0].device_kind.lower()
    except Exception:
        pass
    if "v7" in kind or "tpu7" in kind:
        # 64 MiB VMEM per TC, 2 TCs per chip: 4 MiB/input/buffer, use both TCs.
        return 8192, None, 2
    if any(s in kind for s in ("v4", "v5", "v6")):
        # 128 MiB physical VMEM: 8 MiB/input/buffer.  v4/v5p are megacore.
        n_cores = 2 if ("v4" in kind or "v5p" in kind) else 1
        return 16384, 100 * 1024 * 1024, n_cores
    # Unknown / older generation: conservative tiles, single split.
    return 2048, None, 1


def _mlsm_kernel(*refs, mode, smooth, rows_valid, block_rows, strip_rows,
                 blocks_per_core, mask_possible):
    """Accumulates the partial cross-entropy sum of one core's share of blocks
    into an (8,128) VMEM accumulator; reduces to a scalar in the epilogue."""
    if mode == "wrow":
        x_ref, t_ref, w_ref, out_ref, acc_ref = refs
    elif mode == "full":
        x_ref, t_ref, t1_ref, out_ref, acc_ref = refs
    else:
        x_ref, t_ref, out_ref, acc_ref = refs

    p = pl.program_id(0)              # core / parallel split
    i = pl.program_id(1)              # reduction steps within the split

    @pl.when(i == 0)
    def _():
        acc_ref[...] = jnp.zeros_like(acc_ref)

    blk = p * blocks_per_core + i                 # logical (unclamped) block id
    rem_rows = rows_valid - blk * block_rows      # valid rows in this block

    n_strips = block_rows // strip_rows

    def strip_term(r0, row_iota):
        x = x_ref[pl.ds(r0, strip_rows), :].astype(jnp.float32)
        t = t_ref[pl.ds(r0, strip_rows), :].astype(jnp.float32)
        # sigmoid(z) = 0.5*tanh(0.5*z) + 0.5: one EUP op per sigmoid instead of
        # exp + reciprocal; `+ smooth` is folded into the 0.5 constant.
        log_sig_x = jnp.log(0.5 * jnp.tanh(0.5 * x) + (0.5 + smooth))
        log_sig_1mx = jnp.log(0.5 * jnp.tanh(0.5 * (1.0 - x)) + (0.5 + smooth))
        if mode == "wrow":
            # Per-row (= per-class) weight column, broadcast across 128 lanes.
            t1 = t * w_ref[pl.ds(r0, strip_rows), :].astype(jnp.float32)
        elif mode == "full":
            t1 = t1_ref[pl.ds(r0, strip_rows), :].astype(jnp.float32)
        else:
            # NOTE: target1 == target here, so the first term is intentionally
            # t * t * log(.) -- this matches the PyTorch reference exactly.
            t1 = t
        term = t1 * (t * log_sig_x) + (1.0 - t) * log_sig_1mx
        if row_iota is not None:
            # Tail / duplicated-block masking: local row index vs remaining-row
            # scalar (selected-away lanes may hold garbage/NaN; `where` selects,
            # it does not multiply, so that is safe).
            term = jnp.where(row_iota + r0 < rem_rows, term, 0.0)
        return term

    def accumulate(apply_mask):
        row_iota = (jax.lax.broadcasted_iota(jnp.int32, (strip_rows, LANES), 0)
                    if apply_mask else None)

        def body(s, carry):
            r0 = pl.multiple_of(s * strip_rows, strip_rows)
            term = strip_term(r0, row_iota)
            # vreg-shaped accumulation: reduce only the cheap leading axis.
            acc_ref[...] += term.reshape(strip_rows // SUBLANES, SUBLANES,
                                         LANES).sum(axis=0)
            return carry

        jax.lax.fori_loop(0, n_strips, body, 0)

    if mask_possible:
        needs_mask = rem_rows < block_rows

        @pl.when(needs_mask)
        def _():
            accumulate(True)

        @pl.when(jnp.logical_not(needs_mask))
        def _():
            accumulate(False)
    else:
        accumulate(False)

    @pl.when(i == pl.num_programs(1) - 1)
    def _():
        out_ref[...] = jnp.sum(acc_ref[...]).reshape(1, 1, 1)


def _per_class_weights(wts, target_shape):
    """Return a (classes,) f32 vector if `wts` broadcasts against `target`
    varying only along the class axis (axis 1); otherwise None."""
    wts = jnp.asarray(wts)
    nd = len(target_shape)
    if wts.ndim > nd:
        return None
    wshape = (1,) * (nd - wts.ndim) + tuple(wts.shape)
    for ax in range(nd):
        if ax == 1:
            if wshape[ax] not in (1, target_shape[ax]):
                return None
        elif wshape[ax] != 1:
            return None
    w = wts.reshape(wshape).reshape(-1)
    return jnp.broadcast_to(w, (target_shape[1],)).astype(jnp.float32)


def _jnp_partial_ce(x, t, t1, smooth):
    x = x.astype(jnp.float32)
    t = t.astype(jnp.float32)
    t1 = t1.astype(jnp.float32)
    return (t1 * (t * jnp.log(jax.nn.sigmoid(x) + smooth))
            + (1.0 - t) * jnp.log(jax.nn.sigmoid(1.0 - x) + smooth)).sum()


def custom_mlsm_loss(inp, target, wts=None, smooth=1e-08):
    """Matches Custom_MLSM_Loss.forward semantics."""
    bs = target.shape[0]
    classes = target.shape[1]
    smooth = float(smooth)

    x_flat = inp.reshape(-1)
    t_flat = target.reshape(-1)
    n = x_flat.shape[0]

    spatial = 1
    for d in target.shape[2:]:
        spatial *= d

    # --- how are class weights handled? --------------------------------------
    t1_flat = None
    w_c = None
    if wts is None:
        mode = "none"
    else:
        w_c = _per_class_weights(wts, target.shape)
        if w_c is not None and spatial > 0 and spatial % LANES == 0:
            mode = "wrow"            # stream only a tiny per-row weight column
        else:
            # TODO(synk): general (non-per-class) weights still stream a full
            # materialized (target*wts) array (extra HBM pass).
            mode = "full"
            t1_flat = (target * wts).reshape(-1)

    rows = n // LANES
    prefix = rows * LANES
    tail = n - prefix

    # Tiny inputs: below tiling minima -> plain jnp.
    if rows < SUBLANES:
        t1_small = t_flat if mode == "none" else (
            t1_flat if mode == "full" else (target * wts).reshape(-1))
        partial_ce = _jnp_partial_ce(x_flat, t_flat, t1_small, smooth)
        return -((partial_ce / classes) / bs)

    cap_rows, vmem_limit, n_cores = _tpu_caps()
    if mode != "none":
        cap_rows = max(SUBLANES, cap_rows // 2)   # room for the third stream

    block_rows = min(cap_rows, (rows // SUBLANES) * SUBLANES)   # multiple of 8
    if block_rows > STRIP_ROWS:
        block_rows = (block_rows // STRIP_ROWS) * STRIP_ROWS    # strips divide it
    strip_rows = min(block_rows, STRIP_ROWS)

    n_blocks = pl.cdiv(rows, block_rows)
    n_cores = max(1, min(n_cores, n_blocks))
    blocks_per_core = pl.cdiv(n_blocks, n_cores)
    mask_possible = (rows % block_rows != 0) or (n_blocks % n_cores != 0)

    # (rows, 128) views of the 128-aligned prefix; no pad/concatenate.
    x2d = x_flat[:prefix].reshape(rows, LANES)
    t2d = t_flat[:prefix].reshape(rows, LANES)

    def in_map(p, i):
        # Clamp so every DMA'd block starts in bounds; duplicated / OOB rows
        # are zeroed by the in-kernel mask.
        return (jnp.minimum(p * blocks_per_core + i, n_blocks - 1), 0)

    data_spec = pl.BlockSpec((block_rows, LANES), in_map)
    inputs = [x2d, t2d]
    in_specs = [data_spec, data_spec]

    if mode == "wrow":
        rows_per_slab = spatial // LANES
        w_rows = jnp.repeat(jnp.tile(w_c, bs), rows_per_slab)    # (rows,)
        inputs.append(w_rows.reshape(rows, 1))
        in_specs.append(pl.BlockSpec((block_rows, 1), in_map))
    elif mode == "full":
        inputs.append(t1_flat[:prefix].reshape(rows, LANES))
        in_specs.append(data_spec)

    kernel = functools.partial(
        _mlsm_kernel,
        mode=mode,
        smooth=smooth,
        rows_valid=rows,
        block_rows=block_rows,
        strip_rows=strip_rows,
        blocks_per_core=blocks_per_core,
        mask_possible=mask_possible,
    )

    partials = pl.pallas_call(
        kernel,
        out_shape=jax.ShapeDtypeStruct((n_cores, 1, 1), jnp.float32),
        grid_spec=pltpu.PrefetchScalarGridSpec(
            num_scalar_prefetch=0,
            grid=(n_cores, blocks_per_core),
            in_specs=in_specs,
            out_specs=pl.BlockSpec((1, 1, 1), lambda p, i: (p, 0, 0)),
            scratch_shapes=[pltpu.VMEM((SUBLANES, LANES), jnp.float32)],
        ),
        compiler_params=pltpu.CompilerParams(
            dimension_semantics=("parallel", "arbitrary"),
            vmem_limit_bytes=vmem_limit,
        ),
    )(*inputs)

    partial_ce = jnp.sum(partials)
    if tail:
        # mode "wrow" implies n % 128 == 0, so only "none"/"full" reach here.
        t1_tail = t_flat[prefix:] if mode != "full" else t1_flat[prefix:]
        partial_ce = partial_ce + _jnp_partial_ce(
            x_flat[prefix:], t_flat[prefix:], t1_tail, smooth)

    return -((partial_ce / classes) / bs)


def _reference(inp, target, wts=None, smooth=1e-08):
    bs = target.shape[0]
    classes = target.shape[1]
    if wts is None:
        target1 = target.reshape(-1)
    else:
        target1 = (target * wts).reshape(-1)
    x = inp.reshape(-1).astype(jnp.float32)
    t = target.reshape(-1).astype(jnp.float32)
    partial_ce = (
        target1.astype(jnp.float32) * (t * jnp.log(jax.nn.sigmoid(x) + smooth))
        + (1 - t) * jnp.log(jax.nn.sigmoid(1 - x) + smooth)
    ).sum()
    return -((partial_ce / classes) / bs)


if __name__ == "__main__":
    key = jax.random.PRNGKey(0)
    k1, k2, k3, k4 = jax.random.split(key, 4)

    # (batch=2, classes=4, H=16, W=16) logits & {0,1} labels
    x = jax.random.normal(k1, (2, 4, 16, 16), dtype=jnp.float32)
    tgt = (jax.random.uniform(k2, (2, 4, 16, 16)) > 0.5).astype(jnp.float32)

    # 1) wts = None (two streamed arrays)
    out = jax.block_until_ready(custom_mlsm_loss(x, tgt))
    ref = _reference(x, tgt)
    assert jnp.allclose(out, ref, rtol=1e-5, atol=1e-5), ("none", out, ref)

    # 2) per-class wts: only a tiny per-row weight column is streamed
    wts_c = jnp.array([0.5, 1.0, 2.0, 1.5], dtype=jnp.float32).reshape(1, 4, 1, 1)
    out = jax.block_until_ready(custom_mlsm_loss(x, tgt, wts=wts_c))
    ref = _reference(x, tgt, wts=wts_c)
    assert jnp.allclose(out, ref, rtol=1e-5, atol=1e-5), ("wrow", out, ref)

    # 3) general (non-per-class) wts -> full target1 stream fallback
    wts_g = 0.5 + jax.random.uniform(k3, (1, 1, 16, 1), dtype=jnp.float32)
    out = jax.block_until_ready(custom_mlsm_loss(x, tgt, wts=wts_g))
    ref = _reference(x, tgt, wts=wts_g)
    assert jnp.allclose(out, ref, rtol=1e-5, atol=1e-5), ("full", out, ref)

    # 4) numel not a multiple of 128 -> kernel prefix + plain-jnp tail
    x4 = jax.random.normal(k4, (2, 4, 11, 13), dtype=jnp.float32)
    t4 = (jax.random.uniform(k2, (2, 4, 11, 13)) > 0.5).astype(jnp.float32)
    out = jax.block_until_ready(custom_mlsm_loss(x4, t4))
    ref = _reference(x4, t4)
    assert jnp.allclose(out, ref, rtol=1e-5, atol=1e-5), ("tail", out, ref)

    # 5) rows not a multiple of block_rows -> masked boundary-block path
    x5 = jax.random.normal(k1, (2, 4, 50, 16), dtype=jnp.float32)
    t5 = (jax.random.uniform(k3, (2, 4, 50, 16)) > 0.5).astype(jnp.float32)
    out = jax.block_until_ready(custom_mlsm_loss(x5, t5))
    ref = _reference(x5, t5)
    assert jnp.allclose(out, ref, rtol=1e-5, atol=1e-5), ("mask", out, ref)

    print("KERNEL_OK")
</pallas_src>

<mosaic_0001>
module attributes {stable_mosaic.version = 11 : i64} {
  func.func @_mlsm_kernel(%arg0: i32, %arg1: i32, %arg2: memref<16x128xf32, #tpu.memory_space<vmem>>, %arg3: memref<16x128xf32, #tpu.memory_space<vmem>>, %arg4: memref<1x1x1xf32, #tpu.memory_space<vmem>>, %arg5: memref<8x128xf32, #tpu.memory_space<vmem>>) attributes {dimension_semantics = [#tpu.dimension_semantics<parallel>, #tpu.dimension_semantics<arbitrary>], iteration_bounds = array<i64: 1, 1>, scalar_prefetch = 0 : i64, scratch_operands = 1 : i64, tpu.core_type = #tpu.core_type<tc>, window_params = [{transform_indices = @transform_0, window_bounds = array<i64: 16, 128>}, {transform_indices = @transform_1, window_bounds = array<i64: 16, 128>}, {transform_indices = @transform_2, window_bounds = array<i64: 1, 1, 1>}]} {
    %c0_i32 = arith.constant 0 : i32
    %0 = arith.cmpi eq, %arg1, %c0_i32 : i32
    %1 = arith.extui %0 : i1 to i32
    %c0_i32_0 = arith.constant 0 : i32
    %2 = arith.cmpi ne, %1, %c0_i32_0 : i32
    scf.if %2 {
      %cst_17 = arith.constant 0.000000e+00 : f32
      %41 = vector.broadcast %cst_17 : f32 to vector<8x128xf32>
      %c0_18 = arith.constant 0 : index
      %c0_19 = arith.constant 0 : index
      %42 = vector.load %arg5[%c0_18, %c0_19] : memref<8x128xf32, #tpu.memory_space<vmem>>, vector<8x128xf32>
      tpu.vector_store %arg5[%c0_18, %c0_19], %41 {strides = array<i32>} : memref<8x128xf32, #tpu.memory_space<vmem>>, vector<8x128xf32>,
    } else {
    }
    %c0_i32_1 = arith.constant 0 : i32
    %c16_i32 = arith.constant 16 : i32
    %3 = arith.muli %c0_i32_1, %c16_i32 : i32
    %4 = tpu.assume_multiple %3, 16 : i32
    %5 = arith.index_cast %4 : i32 to index
    %c0 = arith.constant 0 : index
    %6 = vector.load %arg2[%5, %c0] : memref<16x128xf32, #tpu.memory_space<vmem>>, vector<16x128xf32>
    %7 = arith.index_cast %4 : i32 to index
    %c0_2 = arith.constant 0 : index
    %8 = vector.load %arg3[%7, %c0_2] : memref<16x128xf32, #tpu.memory_space<vmem>>, vector<16x128xf32>
    %cst = arith.constant 5.000000e-01 : f32
    %9 = vector.broadcast %cst : f32 to vector<16x128xf32>
    %10 = arith.mulf %9, %6 : vector<16x128xf32>
    %11 = math.tanh %10 : vector<16x128xf32>
    %cst_3 = arith.constant 5.000000e-01 : f32
    %12 = vector.broadcast %cst_3 : f32 to vector<16x128xf32>
    %13 = arith.mulf %12, %11 : vector<16x128xf32>
    %cst_4 = arith.constant 5.000000e-01 : f32
    %14 = vector.broadcast %cst_4 : f32 to vector<16x128xf32>
    %15 = arith.addf %13, %14 : vector<16x128xf32>
    %16 = math.log %15 : vector<16x128xf32>
    %cst_5 = arith.constant 1.000000e+00 : f32
    %17 = vector.broadcast %cst_5 : f32 to vector<16x128xf32>
    %18 = arith.subf %17, %6 : vector<16x128xf32>
    %cst_6 = arith.constant 5.000000e-01 : f32
    %19 = vector.broadcast %cst_6 : f32 to vector<16x128xf32>
    %20 = arith.mulf %19, %18 : vector<16x128xf32>
    %21 = math.tanh %20 : vector<16x128xf32>
    %cst_7 = arith.constant 5.000000e-01 : f32
    %22 = vector.broadcast %cst_7 : f32 to vector<16x128xf32>
    %23 = arith.mulf %22, %21 : vector<16x128xf32>
    %cst_8 = arith.constant 5.000000e-01 : f32
    %24 = vector.broadcast %cst_8 : f32 to vector<16x128xf32>
    %25 = arith.addf %23, %24 : vector<16x128xf32>
    %26 = math.log %25 : vector<16x128xf32>
    %27 = arith.mulf %8, %16 : vector<16x128xf32>
    %28 = arith.mulf %8, %27 : vector<16x128xf32>
    %cst_9 = arith.constant 1.000000e+00 : f32
    %29 = vector.broadcast %cst_9 : f32 to vector<16x128xf32>
    %30 = arith.subf %29, %8 : vector<16x128xf32>
    %31 = arith.mulf %30, %26 : vector<16x128xf32>
    %32 = arith.addf %28, %31 : vector<16x128xf32>
    %c0_10 = arith.constant 0 : index
    %c0_11 = arith.constant 0 : index
    %33 = vector.load %arg5[%c0_10, %c0_11] : memref<8x128xf32, #tpu.memory_space<vmem>>, vector<8x128xf32>
    %34 = vector.shape_cast %32 : vector<16x128xf32> to vector<2x8x128xf32>
    %cst_12 = arith.constant dense<0.000000e+00> : vector<8x128xf32>
    %35 = vector.multi_reduction <add>, %34, %cst_12 [0] : vector<2x8x128xf32> to vector<8x128xf32>
    %36 = arith.addf %33, %35 : vector<8x128xf32>
    %c0_13 = arith.constant 0 : index
    %c0_14 = arith.constant 0 : index
    %37 = vector.load %arg5[%c0_13, %c0_14] : memref<8x128xf32, #tpu.memory_space<vmem>>, vector<8x128xf32>
    tpu.vector_store %arg5[%c0_13, %c0_14], %36 {strides = array<i32>} : memref<8x128xf32, #tpu.memory_space<vmem>>, vector<8x128xf32>,
    %c1_i32 = arith.constant 1 : i32
    %c0_i32_15 = arith.constant 0 : i32
    %38 = arith.cmpi eq, %arg1, %c0_i32_15 : i32
    %39 = arith.extui %38 : i1 to i32
    %c0_i32_16 = arith.constant 0 : i32
    %40 = arith.cmpi ne, %39, %c0_i32_16 : i32
    scf.if %40 {
      %c0_17 = arith.constant 0 : index
      %c0_18 = arith.constant 0 : index
      %41 = vector.load %arg5[%c0_17, %c0_18] : memref<8x128xf32, #tpu.memory_space<vmem>>, vector<8x128xf32>
      %42 = vector.shape_cast %41 : vector<8x128xf32> to vector<1x8x128xf32>
      %cst_19 = arith.constant dense<0.000000e+00> : vector<1xf32>
      %43 = vector.multi_reduction <add>, %42, %cst_19 [1, 2] : vector<1x8x128xf32> to vector<1xf32>
      %44 = vector.shape_cast %43 : vector<1xf32> to vector<1x1x1xf32>
      %45 = vector.extract %44[0, 0, 0] : f32 from vector<1x1x1xf32>
      %46 = vector.broadcast %45 : f32 to vector<1x1x1xf32>
      %c0_20 = arith.constant 0 : index
      %c0_21 = arith.constant 0 : index
      %c0_22 = arith.constant 0 : index
      %47 = vector.load %arg4[%c0_20, %c0_21, %c0_22] : memref<1x1x1xf32, #tpu.memory_space<vmem>>, vector<1x1x1xf32>
      tpu.vector_store %arg4[%c0_20, %c0_21, %c0_22], %46 {strides = array<i32>} : memref<1x1x1xf32, #tpu.memory_space<vmem>>, vector<1x1x1xf32>,
    } else {
    }
    return
  }
  func.func @transform_0(%arg0: i32, %arg1: i32) -> (i32, i32) {
    %c1_i32 = arith.constant 1 : i32
    %0 = arith.muli %arg0, %c1_i32 : i32
    %1 = arith.addi %0, %arg1 : i32
    %c0_i32 = arith.constant 0 : i32
    %2 = arith.minsi %1, %c0_i32 : i32
    %c0_i32_0 = arith.constant 0 : i32
    %c0_i32_1 = arith.constant 0 : i32
    return %2, %c0_i32_0 : i32, i32
  }
  func.func @transform_1(%arg0: i32, %arg1: i32) -> (i32, i32) {
    %c1_i32 = arith.constant 1 : i32
    %0 = arith.muli %arg0, %c1_i32 : i32
    %1 = arith.addi %0, %arg1 : i32
    %c0_i32 = arith.constant 0 : i32
    %2 = arith.minsi %1, %c0_i32 : i32
    %c0_i32_0 = arith.constant 0 : i32
    %c0_i32_1 = arith.constant 0 : i32
    return %2, %c0_i32_0 : i32, i32
  }
  func.func @transform_2(%arg0: i32, %arg1: i32) -> (i32, i32, i32) {
    %c0_i32 = arith.constant 0 : i32
    %c0_i32_0 = arith.constant 0 : i32
    %c0_i32_1 = arith.constant 0 : i32
    return %arg0, %c0_i32, %c0_i32_0 : i32, i32, i32
  }
}

</mosaic_0001>

<bundles_post_ra>
// kernel: tpu_custom_call.1
= control target key start
LH: loop header
LB: loop body
LE: loop exit
PB: predicated region body
PF: predicated region fallthrough
CT: control target
= control target key end

     0   :  { %7 = vsyncpa [#allocation4], 0  ;;  %s281_s0 = inlined_call_operand.hbm [shape: f32[16,128], index: 0, kind: input, shape index: {}]   ;;  %s282_s1 = inlined_call_operand.hbm [shape: f32[16,128], index: 1, kind: input, shape index: {}]   ;;  %s283_s2 = inlined_call_operand.hbm [shape: f32[1,1,1], index: 2, kind: output, shape index: {}]  }
   0x1   :  { %8 = vsyncpa [#allocation7], 0 }
   0x2   :  { %9 = vsyncpa [#allocation5], 0  ;;  %s20_s11 = sshll.u32 %s281_s0, 4  ;;  %s252_s12 = smov [#allocation3]   ;;  %s21_s11 = int_to_ptr.hbm [resolvable:$true] %s20_s11 }
   0x3   :  { %s22_s13 = sshll.u32 %s252_s12, 4  ;;  %s39_s16 = sshll.u32 %s282_s1, 4  ;;  %s23_s13 = int_to_ptr.vmem [resolvable:$true] %s22_s13  ;;  %s40_s16 = int_to_ptr.hbm [resolvable:$true] %s39_s16 }
   0x4   :  { %s253_s17 = smov 128   ;;  %s254_s18 = smov 8  }
   0x5   :  { %28 = dma.hbm_to_vmem [thread:$0]  %s21_s11, 256, %s23_s13, [#allocation4], %s253_s17, %s253_s17, %s254_s18  }
   0x6   :  { %s255_s19 = smov [#allocation6]  }
   0x7   :  { %s41_s20 = sshll.u32 %s255_s19, 4  ;;  %s42_s20 = int_to_ptr.vmem [resolvable:$true] %s41_s20 }
   0x8   :  { %47 = dma.hbm_to_vmem [thread:$0]  %s40_s16, 256, %s42_s20, [#allocation7], %s253_s17, %s253_s17, %s254_s18  }
   0x9   :  { %246 = dma.done.wait [#allocation4], 256  }
   0xa   :  { %247 = vsyncadd [#allocation4], 4294967040 }
   0xb   :  { %248 = dma.done.wait [#allocation7], 256  }
   0xc   :  { %249 = vsyncadd [#allocation7], 4294967040  ;;  %v69_v0 = vld [vmem:[#allocation3] sm:$0xff]  ;;  %v70_v1 = vld [vmem:[#allocation3 + $0x8] sm:$0xff]  ;;  %s256_s0 = smov [#allocation8]   ;;  %s136_s23 = sshll.u32 %s283_s2, 4  ;;  %s137_s23 = int_to_ptr.hbm [resolvable:$true] %s136_s23 }
   0xd   :  { %v73_v2 = vmul.f32 0.5, %v69_v0  ;;  %v74_v3 = vmul.f32 0.5, %v70_v1  ;;  %v85_v4 = vsub.f32 1.0, %v69_v0  ;;  %v86_v5 = vsub.f32 1.0, %v70_v1  ;;  %v71_v20 = vld [vmem:[#allocation6] sm:$0xff]  ;;  %v72_v21 = vld [vmem:[#allocation6 + $0x8] sm:$0xff] }
   0xe   :  { %v103_v25 = vsub.f32 1.0, %v71_v20  ;;  %v104_v28 = vsub.f32 1.0, %v72_v21  ;;  %s134_s1 = sshll.u32 %s256_s0, 4  ;;  %vm127_vm0 = vcmask 0   ;;  %s135_s1 = int_to_ptr.vmem [resolvable:$true] %s134_s1 }
   0xf   :  { %158 = vtanh.f32 %v73_v2  ;;  %v87_v6 = vmul.f32 0.5, %v85_v4  ;;  %v88_v7 = vmul.f32 0.5, %v86_v5 }
  0x10   :  { %160 = vtanh.f32 %v74_v3 }
  0x11   :  { %162 = vtanh.f32 %v87_v6 }
  0x12   :  { %164 = vtanh.f32 %v88_v7 }
  0x15   :  { %v159_v8 = vpop.eup %158 }
  0x16   :  { %v161_v9 = vpop.eup %160  ;;  %v77_v10 = vmul.f32 0.5, %v159_v8 }
  0x17   :  { %v163_v11 = vpop.eup %162  ;;  %v78_v12 = vmul.f32 0.5, %v161_v9 }
  0x18   :  { %v165_v13 = vpop.eup %164  ;;  %v79_v14 = vadd.f32 0.5, %v77_v10  ;;  %v91_v15 = vmul.f32 0.5, %v163_v11 }
  0x19   :  { %v80_v16 = vadd.f32 0.5, %v78_v12  ;;  %v92_v17 = vmul.f32 0.5, %v165_v13 }
  0x1a   :  { %166 = vlog2.f32 %v79_v14  ;;  %v93_v18 = vadd.f32 0.5, %v91_v15 }
  0x1b   :  { %168 = vlog2.f32 %v80_v16  ;;  %v94_v19 = vadd.f32 0.5, %v92_v17 }
  0x1c   :  { %170 = vlog2.f32 %v93_v18 }
  0x1d   :  { %172 = vlog2.f32 %v94_v19 }
  0x20   :  { %v167_v22 = vpop.eup %166 }
  0x21   :  { %v169_v23 = vpop.eup %168  ;;  %v82_v24 = vmul.f32 0.6931472, %v167_v22 }
  0x22   :  { %v171_v26 = vpop.eup %170  ;;  %v84_v27 = vmul.f32 0.6931472, %v169_v23 }
  0x23   :  { %v173_v29 = vpop.eup %172  ;;  %v96_v30 = vmul.f32 0.6931472, %v171_v26  ;;  %v99_v31 = vmul.f32 %v82_v24, %v71_v20 }
  0x24   :  { %v98_v32 = vmul.f32 0.6931472, %v173_v29  ;;  %v100_v33 = vmul.f32 %v84_v27, %v72_v21 }
  0x25   :  { %v101_v34 = vmul.f32 %v99_v31, %v71_v20  ;;  %v105_v35 = vmul.f32 %v103_v25, %v96_v30 }
  0x26   :  { %v102_v36 = vmul.f32 %v100_v33, %v72_v21  ;;  %v106_v37 = vmul.f32 %v104_v28, %v98_v32 }
  0x27   :  { %v107_v38 = vadd.f32 %v105_v35, %v101_v34 }
  0x28   :  { %v108_v39 = vadd.f32 %v106_v37, %v102_v36 }
  0x2a   :  { %v110_v40 = vadd.f32 %v108_v39, %v107_v38 }
  0x2c   :  { %117 = vadd.xlane.f32.xlu0 %v110_v40 }
  0x9f   :  { %v118_v41 = vpop.xlane.xlu0 %117 }
  0xa0   :  { %v119_v42 = vrot.slane %v118_v41, 4 }
  0xa2   :  { %v120_v43 = vadd.f32 %v119_v42, %v118_v41 }
  0xa4   :  { %v121_v44 = vrot.slane %v120_v43, 2 }
  0xa6   :  { %v122_v45 = vadd.f32 %v121_v44, %v120_v43 }
  0xa8   :  { %v123_v46 = vrot.slane %v122_v45, 1 }
  0xaa   :  { %v124_v47 = vadd.f32 %v123_v46, %v122_v45 }
  0xac   :  { %151 = vpush %v124_v47 }
  0xdd   :  { %s152_s24 = spop %151 }
  0xde   :  { %v126_v48 = vstv %s152_s24 }
  0xdf   :  { %128 = vst.msk [vmem:[#allocation8] sm:$0x1] %vm127_vm0, %v126_v48 }
  0xe0   :  { %139 = dma.vmem_to_hbm [thread:$0]  %s135_s1, 16, %s137_s23, [#allocation5]  }
  0xe1   :  { %250 = dma.done.wait [#allocation5], 16  }
  0xe2   :  { %251 = vsyncadd [#allocation5], 4294967280 }
  0xe3   :  { %144 = vsyncpa [#allocation4], 1 }
  0xe4   :  { %145 = vsyncpa [#allocation7], 1 }
  0xe5   :  { %146 = vsyncpa [#allocation5], 1 }

</bundles_post_ra>
